<compile_context>
chip_gen: v5e
topology: v5e:2x2
jax: 0.10.0
libtpu: 0.0.40
codegen_flags: <defaults>
</compile_context>

<pallas_src>
import functools

import jax
import jax.numpy as jnp
from jax import lax
from jax.experimental import pallas as pl
from jax.experimental.pallas import tpu as pltpu

LANE = 128   # TPU vreg lane width
CHUNK = 32   # sublane rows processed per inner-loop iteration (bounds live vregs)


# ----------------------------------------------------------------------------
# Kernel
# ----------------------------------------------------------------------------
def mlp_kernel(x_ref, w1_ref, b1_ref, w2_ref, b2_ref, o_ref):
    # x_ref : (2, SB, 128)  VMEM   batch dense on (sublane, lane), compute dtype
    # w1_ref: (10, 2)       SMEM   0.5 * fc1.weight        (f32)
    # b1_ref: (10,)         SMEM   0.5 * fc1.bias          (f32)
    # w2_ref: (2, 10)       SMEM   0.5 * fc2.weight        (f32)
    # b2_ref: (2,)          SMEM   fc2.bias + 0.5*sum_j fc2.weight[:, j]  (f32)
    # o_ref : (2, SB, 128)  VMEM   output dtype
    cdt = x_ref.dtype
    sb = x_ref.shape[1]
    n_chunks = sb // CHUNK

    # Hoist the (cheap, scalar) SMEM reads + dtype casts out of the chunk loop.
    w1c = [[w1_ref[j, k].astype(cdt) for k in range(2)] for j in range(10)]
    b1c = [b1_ref[j].astype(cdt) for j in range(10)]
    w2c = [[w2_ref[i, j].astype(cdt) for j in range(10)] for i in range(2)]
    b2c = [b2_ref[i].astype(cdt) for i in range(2)]

    # Process the tile CHUNK sublane-rows at a time so the live set stays at
    # ~5 chunk-sized values (x0, x1, acc0, acc1, t) regardless of tile size.
    @pl.loop(0, n_chunks)
    def _(c):
        r0 = pl.multiple_of(c * CHUNK, CHUNK)
        x0 = x_ref[0, pl.ds(r0, CHUNK), :]
        x1 = x_ref[1, pl.ds(r0, CHUNK), :]

        # j = 0 initializes the two output accumulators (no zeros broadcast).
        z = w1c[0][0] * x0 + w1c[0][1] * x1 + b1c[0]
        t = jnp.tanh(z)                      # sigmoid folded: one EUP op / feature
        acc0 = w2c[0][0] * t
        acc1 = w2c[1][0] * t

        # Fused fc1 -> tanh -> fc2 accumulation; h_j is never materialized.
        for j in range(1, 10):
            z = w1c[j][0] * x0 + w1c[j][1] * x1 + b1c[j]
            t = jnp.tanh(z)
            acc0 = acc0 + w2c[0][j] * t
            acc1 = acc1 + w2c[1][j] * t

        o_ref[0, pl.ds(r0, CHUNK), :] = (acc0 + b2c[0]).astype(o_ref.dtype)
        o_ref[1, pl.ds(r0, CHUNK), :] = (acc1 + b2c[1]).astype(o_ref.dtype)


# ----------------------------------------------------------------------------
# Wrapper plumbing
# ----------------------------------------------------------------------------
def _default_compute_dtype():
    """bf16 where VALU/EUP are bf16-native (v6e/v7x); f32 elsewhere (v5e/older)."""
    try:
        kind = jax.devices()[0].device_kind.lower()
    except Exception:  # pragma: no cover
        return jnp.float32
    if "v6" in kind or "v7" in kind:
        return jnp.bfloat16
    return jnp.float32


def _tile_plan(batch, block_rows):
    """Pick (sublane rows per tile, grid steps, padded batch)."""
    nb = -(-batch // LANE)                         # 128-wide lane groups
    sb_cap = max(CHUNK, (block_rows // CHUNK) * CHUNK)
    min_steps = 8                                  # pipelining + v7x megacore split
    sb = min(sb_cap, max(1, -(-nb // min_steps)))
    sb = -(-sb // CHUNK) * CHUNK                   # multiple of the chunk size
    grid_n = -(-nb // sb)
    return sb, grid_n, grid_n * sb * LANE


def _fold_params(w1, b1, w2, b2):
    """Fold sigmoid(u) = 0.5*(1 + tanh(u/2)) into the (tiny) weights."""
    w1f = w1.astype(jnp.float32)
    b1f = b1.astype(jnp.float32)
    w2f = w2.astype(jnp.float32)
    b2f = b2.astype(jnp.float32)
    return 0.5 * w1f, 0.5 * b1f, 0.5 * w2f, b2f + 0.5 * jnp.sum(w2f, axis=1)


def _mlp_call(xt, w1p, b1p, w2p, b2p, sb, grid_n, out_dtype):
    smem = pl.BlockSpec(memory_space=pltpu.MemorySpace.SMEM)
    tile = pl.BlockSpec((2, sb, LANE), lambda i: (0, i, 0))
    return pl.pallas_call(
        mlp_kernel,
        out_shape=jax.ShapeDtypeStruct((2, grid_n * sb, LANE), out_dtype),
        grid=(grid_n,),
        in_specs=[tile, smem, smem, smem, smem],
        out_specs=tile,
        compiler_params=pltpu.CompilerParams(
            dimension_semantics=("parallel",)),
    )(xt, w1p, b1p, w2p, b2p)


def _forward_impl(x, w1, b1, w2, b2, block_rows, compute_dtype):
    """Batch-major API: x (B, 2) -> (B, 2), output dtype follows x."""
    B = x.shape[0]
    out_dtype = x.dtype
    sb, grid_n, Bp = _tile_plan(B, block_rows)
    w1p, b1p, w2p, b2p = _fold_params(w1, b1, w2, b2)
    # Feature-major, lane-dense layout; cast first so the transpose/pad pass
    # moves half-width data when compute_dtype is bf16.
    xt = jnp.pad(x.astype(compute_dtype).T, ((0, 0), (0, Bp - B)))
    xt = xt.reshape(2, grid_n * sb, LANE)
    yt = _mlp_call(xt, w1p, b1p, w2p, b2p, sb, grid_n, out_dtype)
    return yt.reshape(2, Bp).T[:B]


def _forward_fm_impl(x2b, w1, b1, w2, b2, block_rows, compute_dtype):
    """Feature-major API: x2b (2, B) -> (2, B); avoids transpose HBM passes."""
    B = x2b.shape[1]
    out_dtype = x2b.dtype
    sb, grid_n, Bp = _tile_plan(B, block_rows)
    w1p, b1p, w2p, b2p = _fold_params(w1, b1, w2, b2)
    xt = jnp.pad(x2b.astype(compute_dtype), ((0, 0), (0, Bp - B)))
    xt = xt.reshape(2, grid_n * sb, LANE)
    yt = _mlp_call(xt, w1p, b1p, w2p, b2p, sb, grid_n, out_dtype)
    return yt.reshape(2, Bp)[:, :B]


_forward_jit = jax.jit(_forward_impl, static_argnums=(5, 6))
_forward_fm_jit = jax.jit(_forward_fm_impl, static_argnums=(5, 6))


def classifier_forward(x, w1, b1, w2, b2, *, block_rows=2048, compute_dtype=None):
    """PyTorch-compatible forward: x (B, 2) f32 -> (B, 2) f32.

    Weights are torch-native: w1 (10, 2), b1 (10,), w2 (2, 10), b2 (2,).
    compute_dtype defaults to bf16 on v6e/v7x and f32 elsewhere.
    """
    if compute_dtype is None:
        compute_dtype = _default_compute_dtype()
    return _forward_jit(x, w1, b1, w2, b2, int(block_rows), jnp.dtype(compute_dtype))


def classifier_forward_feature_major(x2b, w1, b1, w2, b2, *, block_rows=2048,
                                     compute_dtype=None):
    """Feature-major forward: x2b (2, B) -> (2, B). No transpose passes."""
    if compute_dtype is None:
        compute_dtype = _default_compute_dtype()
    return _forward_fm_jit(x2b, w1, b1, w2, b2, int(block_rows),
                           jnp.dtype(compute_dtype))


# ----------------------------------------------------------------------------
# Parameters / reference
# ----------------------------------------------------------------------------
def init_params(key):
    """torch.nn.Linear-shaped params with PyTorch-style uniform init."""
    k1, k2, k3, k4 = jax.random.split(key, 4)
    lim1 = 1.0 / jnp.sqrt(2.0)
    lim2 = 1.0 / jnp.sqrt(10.0)
    w1 = jax.random.uniform(k1, (10, 2), jnp.float32, -lim1, lim1)
    b1 = jax.random.uniform(k2, (10,), jnp.float32, -lim1, lim1)
    w2 = jax.random.uniform(k3, (2, 10), jnp.float32, -lim2, lim2)
    b2 = jax.random.uniform(k4, (2,), jnp.float32, -lim2, lim2)
    return w1, b1, w2, b2


def _reference(x, w1, b1, w2, b2):
    hp = jax.lax.Precision.HIGHEST  # true-f32 reference (no MXU bf16 rounding)
    h = jax.nn.sigmoid(jnp.dot(x, w1.T, precision=hp) + b1)
    return jnp.dot(h, w2.T, precision=hp) + b2


# ----------------------------------------------------------------------------
# Demo / self-test
# ----------------------------------------------------------------------------
if __name__ == "__main__":
    key = jax.random.PRNGKey(0)
    kx, kp = jax.random.split(key)
    w1, b1, w2, b2 = init_params(kp)

    auto_dt = jnp.dtype(_default_compute_dtype())
    # bf16 compute on v6e/v7x trades ~1e-2-scale absolute error for ~2x VALU
    # throughput; f32 path is near-exact.
    tol_auto = 1e-1 if auto_dt == jnp.dtype(jnp.bfloat16) else 1e-4

    # 1) Small batch, exact f32 path (note: at B=8 plain XLA fusion would win;
    #    the kernel targets large-batch serving).
    B = 8
    x = jax.random.normal(kx, (B, 2), jnp.float32)
    y = jax.block_until_ready(
        classifier_forward(x, w1, b1, w2, b2, compute_dtype=jnp.float32))
    ref = _reference(x, w1, b1, w2, b2)
    assert y.shape == (B, 2)
    assert jnp.allclose(y, ref, atol=1e-4, rtol=0.0), float(jnp.max(jnp.abs(y - ref)))

    # 2) Larger batch: multi-step pipelined grid (grid_n > 1) AND multi-chunk
    #    in-kernel loop, using the auto-selected compute dtype.
    B2 = 40960
    x2 = jax.random.normal(kx, (B2, 2), jnp.float32)
    y2 = jax.block_until_ready(classifier_forward(x2, w1, b1, w2, b2))
    ref2 = _reference(x2, w1, b1, w2, b2)
    assert y2.shape == (B2, 2)
    assert jnp.allclose(y2, ref2, atol=tol_auto, rtol=0.0), \
        float(jnp.max(jnp.abs(y2 - ref2)))

    # 3) Feature-major entry point (skips the transpose plumbing around the
    #    kernel when the caller can keep (2, B) layout).
    y3 = jax.block_until_ready(
        classifier_forward_feature_major(x2.T, w1, b1, w2, b2))
    assert y3.shape == (2, B2)
    assert jnp.allclose(y3.T, ref2, atol=tol_auto, rtol=0.0), \
        float(jnp.max(jnp.abs(y3.T - ref2)))

    print("KERNEL_OK")
</pallas_src>

<mosaic_0001>
module attributes {stable_mosaic.version = 11 : i64} {
  func.func @mlp_kernel(%arg0: i32, %arg1: memref<2x32x128xf32, #tpu.memory_space<vmem>>, %arg2: memref<10x2xf32, #tpu.memory_space<smem>>, %arg3: memref<10xf32, #tpu.memory_space<smem>>, %arg4: memref<2x10xf32, #tpu.memory_space<smem>>, %arg5: memref<2xf32, #tpu.memory_space<smem>>, %arg6: memref<2x32x128xf32, #tpu.memory_space<vmem>>) attributes {dimension_semantics = [#tpu.dimension_semantics<parallel>], iteration_bounds = array<i64: 1>, scalar_prefetch = 0 : i64, scratch_operands = 0 : i64, tpu.core_type = #tpu.core_type<tc>, window_params = [{transform_indices = @transform_0, window_bounds = array<i64: 2, 32, 128>}, {transform_indices = @transform_1, window_bounds = array<i64: 10, 2>}, {transform_indices = @transform_2, window_bounds = array<i64: 10>}, {transform_indices = @transform_3, window_bounds = array<i64: 2, 10>}, {transform_indices = @transform_4, window_bounds = array<i64: 2>}, {transform_indices = @transform_5, window_bounds = array<i64: 2, 32, 128>}]} {
    %c0 = arith.constant 0 : index
    %c0_0 = arith.constant 0 : index
    %0 = memref.load %arg2[%c0, %c0_0] : memref<10x2xf32, #tpu.memory_space<smem>>
    %c0_1 = arith.constant 0 : index
    %c1 = arith.constant 1 : index
    %1 = memref.load %arg2[%c0_1, %c1] : memref<10x2xf32, #tpu.memory_space<smem>>
    %c1_2 = arith.constant 1 : index
    %c0_3 = arith.constant 0 : index
    %2 = memref.load %arg2[%c1_2, %c0_3] : memref<10x2xf32, #tpu.memory_space<smem>>
    %c1_4 = arith.constant 1 : index
    %c1_5 = arith.constant 1 : index
    %3 = memref.load %arg2[%c1_4, %c1_5] : memref<10x2xf32, #tpu.memory_space<smem>>
    %c2 = arith.constant 2 : index
    %c0_6 = arith.constant 0 : index
    %4 = memref.load %arg2[%c2, %c0_6] : memref<10x2xf32, #tpu.memory_space<smem>>
    %c2_7 = arith.constant 2 : index
    %c1_8 = arith.constant 1 : index
    %5 = memref.load %arg2[%c2_7, %c1_8] : memref<10x2xf32, #tpu.memory_space<smem>>
    %c3 = arith.constant 3 : index
    %c0_9 = arith.constant 0 : index
    %6 = memref.load %arg2[%c3, %c0_9] : memref<10x2xf32, #tpu.memory_space<smem>>
    %c3_10 = arith.constant 3 : index
    %c1_11 = arith.constant 1 : index
    %7 = memref.load %arg2[%c3_10, %c1_11] : memref<10x2xf32, #tpu.memory_space<smem>>
    %c4 = arith.constant 4 : index
    %c0_12 = arith.constant 0 : index
    %8 = memref.load %arg2[%c4, %c0_12] : memref<10x2xf32, #tpu.memory_space<smem>>
    %c4_13 = arith.constant 4 : index
    %c1_14 = arith.constant 1 : index
    %9 = memref.load %arg2[%c4_13, %c1_14] : memref<10x2xf32, #tpu.memory_space<smem>>
    %c5 = arith.constant 5 : index
    %c0_15 = arith.constant 0 : index
    %10 = memref.load %arg2[%c5, %c0_15] : memref<10x2xf32, #tpu.memory_space<smem>>
    %c5_16 = arith.constant 5 : index
    %c1_17 = arith.constant 1 : index
    %11 = memref.load %arg2[%c5_16, %c1_17] : memref<10x2xf32, #tpu.memory_space<smem>>
    %c6 = arith.constant 6 : index
    %c0_18 = arith.constant 0 : index
    %12 = memref.load %arg2[%c6, %c0_18] : memref<10x2xf32, #tpu.memory_space<smem>>
    %c6_19 = arith.constant 6 : index
    %c1_20 = arith.constant 1 : index
    %13 = memref.load %arg2[%c6_19, %c1_20] : memref<10x2xf32, #tpu.memory_space<smem>>
    %c7 = arith.constant 7 : index
    %c0_21 = arith.constant 0 : index
    %14 = memref.load %arg2[%c7, %c0_21] : memref<10x2xf32, #tpu.memory_space<smem>>
    %c7_22 = arith.constant 7 : index
    %c1_23 = arith.constant 1 : index
    %15 = memref.load %arg2[%c7_22, %c1_23] : memref<10x2xf32, #tpu.memory_space<smem>>
    %c8 = arith.constant 8 : index
    %c0_24 = arith.constant 0 : index
    %16 = memref.load %arg2[%c8, %c0_24] : memref<10x2xf32, #tpu.memory_space<smem>>
    %c8_25 = arith.constant 8 : index
    %c1_26 = arith.constant 1 : index
    %17 = memref.load %arg2[%c8_25, %c1_26] : memref<10x2xf32, #tpu.memory_space<smem>>
    %c9 = arith.constant 9 : index
    %c0_27 = arith.constant 0 : index
    %18 = memref.load %arg2[%c9, %c0_27] : memref<10x2xf32, #tpu.memory_space<smem>>
    %c9_28 = arith.constant 9 : index
    %c1_29 = arith.constant 1 : index
    %19 = memref.load %arg2[%c9_28, %c1_29] : memref<10x2xf32, #tpu.memory_space<smem>>
    %c0_30 = arith.constant 0 : index
    %20 = memref.load %arg3[%c0_30] : memref<10xf32, #tpu.memory_space<smem>>
    %c1_31 = arith.constant 1 : index
    %21 = memref.load %arg3[%c1_31] : memref<10xf32, #tpu.memory_space<smem>>
    %c2_32 = arith.constant 2 : index
    %22 = memref.load %arg3[%c2_32] : memref<10xf32, #tpu.memory_space<smem>>
    %c3_33 = arith.constant 3 : index
    %23 = memref.load %arg3[%c3_33] : memref<10xf32, #tpu.memory_space<smem>>
    %c4_34 = arith.constant 4 : index
    %24 = memref.load %arg3[%c4_34] : memref<10xf32, #tpu.memory_space<smem>>
    %c5_35 = arith.constant 5 : index
    %25 = memref.load %arg3[%c5_35] : memref<10xf32, #tpu.memory_space<smem>>
    %c6_36 = arith.constant 6 : index
    %26 = memref.load %arg3[%c6_36] : memref<10xf32, #tpu.memory_space<smem>>
    %c7_37 = arith.constant 7 : index
    %27 = memref.load %arg3[%c7_37] : memref<10xf32, #tpu.memory_space<smem>>
    %c8_38 = arith.constant 8 : index
    %28 = memref.load %arg3[%c8_38] : memref<10xf32, #tpu.memory_space<smem>>
    %c9_39 = arith.constant 9 : index
    %29 = memref.load %arg3[%c9_39] : memref<10xf32, #tpu.memory_space<smem>>
    %c0_40 = arith.constant 0 : index
    %c0_41 = arith.constant 0 : index
    %30 = memref.load %arg4[%c0_40, %c0_41] : memref<2x10xf32, #tpu.memory_space<smem>>
    %c0_42 = arith.constant 0 : index
    %c1_43 = arith.constant 1 : index
    %31 = memref.load %arg4[%c0_42, %c1_43] : memref<2x10xf32, #tpu.memory_space<smem>>
    %c0_44 = arith.constant 0 : index
    %c2_45 = arith.constant 2 : index
    %32 = memref.load %arg4[%c0_44, %c2_45] : memref<2x10xf32, #tpu.memory_space<smem>>
    %c0_46 = arith.constant 0 : index
    %c3_47 = arith.constant 3 : index
    %33 = memref.load %arg4[%c0_46, %c3_47] : memref<2x10xf32, #tpu.memory_space<smem>>
    %c0_48 = arith.constant 0 : index
    %c4_49 = arith.constant 4 : index
    %34 = memref.load %arg4[%c0_48, %c4_49] : memref<2x10xf32, #tpu.memory_space<smem>>
    %c0_50 = arith.constant 0 : index
    %c5_51 = arith.constant 5 : index
    %35 = memref.load %arg4[%c0_50, %c5_51] : memref<2x10xf32, #tpu.memory_space<smem>>
    %c0_52 = arith.constant 0 : index
    %c6_53 = arith.constant 6 : index
    %36 = memref.load %arg4[%c0_52, %c6_53] : memref<2x10xf32, #tpu.memory_space<smem>>
    %c0_54 = arith.constant 0 : index
    %c7_55 = arith.constant 7 : index
    %37 = memref.load %arg4[%c0_54, %c7_55] : memref<2x10xf32, #tpu.memory_space<smem>>
    %c0_56 = arith.constant 0 : index
    %c8_57 = arith.constant 8 : index
    %38 = memref.load %arg4[%c0_56, %c8_57] : memref<2x10xf32, #tpu.memory_space<smem>>
    %c0_58 = arith.constant 0 : index
    %c9_59 = arith.constant 9 : index
    %39 = memref.load %arg4[%c0_58, %c9_59] : memref<2x10xf32, #tpu.memory_space<smem>>
    %c1_60 = arith.constant 1 : index
    %c0_61 = arith.constant 0 : index
    %40 = memref.load %arg4[%c1_60, %c0_61] : memref<2x10xf32, #tpu.memory_space<smem>>
    %c1_62 = arith.constant 1 : index
    %c1_63 = arith.constant 1 : index
    %41 = memref.load %arg4[%c1_62, %c1_63] : memref<2x10xf32, #tpu.memory_space<smem>>
    %c1_64 = arith.constant 1 : index
    %c2_65 = arith.constant 2 : index
    %42 = memref.load %arg4[%c1_64, %c2_65] : memref<2x10xf32, #tpu.memory_space<smem>>
    %c1_66 = arith.constant 1 : index
    %c3_67 = arith.constant 3 : index
    %43 = memref.load %arg4[%c1_66, %c3_67] : memref<2x10xf32, #tpu.memory_space<smem>>
    %c1_68 = arith.constant 1 : index
    %c4_69 = arith.constant 4 : index
    %44 = memref.load %arg4[%c1_68, %c4_69] : memref<2x10xf32, #tpu.memory_space<smem>>
    %c1_70 = arith.constant 1 : index
    %c5_71 = arith.constant 5 : index
    %45 = memref.load %arg4[%c1_70, %c5_71] : memref<2x10xf32, #tpu.memory_space<smem>>
    %c1_72 = arith.constant 1 : index
    %c6_73 = arith.constant 6 : index
    %46 = memref.load %arg4[%c1_72, %c6_73] : memref<2x10xf32, #tpu.memory_space<smem>>
    %c1_74 = arith.constant 1 : index
    %c7_75 = arith.constant 7 : index
    %47 = memref.load %arg4[%c1_74, %c7_75] : memref<2x10xf32, #tpu.memory_space<smem>>
    %c1_76 = arith.constant 1 : index
    %c8_77 = arith.constant 8 : index
    %48 = memref.load %arg4[%c1_76, %c8_77] : memref<2x10xf32, #tpu.memory_space<smem>>
    %c1_78 = arith.constant 1 : index
    %c9_79 = arith.constant 9 : index
    %49 = memref.load %arg4[%c1_78, %c9_79] : memref<2x10xf32, #tpu.memory_space<smem>>
    %c0_80 = arith.constant 0 : index
    %50 = memref.load %arg5[%c0_80] : memref<2xf32, #tpu.memory_space<smem>>
    %c1_81 = arith.constant 1 : index
    %51 = memref.load %arg5[%c1_81] : memref<2xf32, #tpu.memory_space<smem>>
    %c0_i32 = arith.constant 0 : i32
    %c1_i32 = arith.constant 1 : i32
    %52 = arith.muli %c0_i32, %c1_i32 : i32
    %c0_i32_82 = arith.constant 0 : i32
    %53 = arith.addi %c0_i32_82, %52 : i32
    %c32_i32 = arith.constant 32 : i32
    %54 = arith.muli %53, %c32_i32 : i32
    %55 = tpu.assume_multiple %54, 32 : i32
    %c0_83 = arith.constant 0 : index
    %56 = arith.index_cast %55 : i32 to index
    %c0_84 = arith.constant 0 : index
    %57 = vector.load %arg1[%c0_83, %56, %c0_84] : memref<2x32x128xf32, #tpu.memory_space<vmem>>, vector<1x32x128xf32>
    %58 = vector.shape_cast %57 : vector<1x32x128xf32> to vector<32x128xf32>
    %c1_85 = arith.constant 1 : index
    %59 = arith.index_cast %55 : i32 to index
    %c0_86 = arith.constant 0 : index
    %60 = vector.load %arg1[%c1_85, %59, %c0_86] : memref<2x32x128xf32, #tpu.memory_space<vmem>>, vector<1x32x128xf32>
    %61 = vector.shape_cast %60 : vector<1x32x128xf32> to vector<32x128xf32>
    %62 = vector.broadcast %0 : f32 to vector<32x128xf32>
    %63 = arith.mulf %62, %58 : vector<32x128xf32>
    %64 = vector.broadcast %1 : f32 to vector<32x128xf32>
    %65 = arith.mulf %64, %61 : vector<32x128xf32>
    %66 = arith.addf %63, %65 : vector<32x128xf32>
    %67 = vector.broadcast %20 : f32 to vector<32x128xf32>
    %68 = arith.addf %66, %67 : vector<32x128xf32>
    %69 = math.tanh %68 : vector<32x128xf32>
    %70 = vector.broadcast %30 : f32 to vector<32x128xf32>
    %71 = arith.mulf %70, %69 : vector<32x128xf32>
    %72 = vector.broadcast %40 : f32 to vector<32x128xf32>
    %73 = arith.mulf %72, %69 : vector<32x128xf32>
    %74 = vector.broadcast %2 : f32 to vector<32x128xf32>
    %75 = arith.mulf %74, %58 : vector<32x128xf32>
    %76 = vector.broadcast %3 : f32 to vector<32x128xf32>
    %77 = arith.mulf %76, %61 : vector<32x128xf32>
    %78 = arith.addf %75, %77 : vector<32x128xf32>
    %79 = vector.broadcast %21 : f32 to vector<32x128xf32>
    %80 = arith.addf %78, %79 : vector<32x128xf32>
    %81 = math.tanh %80 : vector<32x128xf32>
    %82 = vector.broadcast %31 : f32 to vector<32x128xf32>
    %83 = arith.mulf %82, %81 : vector<32x128xf32>
    %84 = arith.addf %71, %83 : vector<32x128xf32>
    %85 = vector.broadcast %41 : f32 to vector<32x128xf32>
    %86 = arith.mulf %85, %81 : vector<32x128xf32>
    %87 = arith.addf %73, %86 : vector<32x128xf32>
    %88 = vector.broadcast %4 : f32 to vector<32x128xf32>
    %89 = arith.mulf %88, %58 : vector<32x128xf32>
    %90 = vector.broadcast %5 : f32 to vector<32x128xf32>
    %91 = arith.mulf %90, %61 : vector<32x128xf32>
    %92 = arith.addf %89, %91 : vector<32x128xf32>
    %93 = vector.broadcast %22 : f32 to vector<32x128xf32>
    %94 = arith.addf %92, %93 : vector<32x128xf32>
    %95 = math.tanh %94 : vector<32x128xf32>
    %96 = vector.broadcast %32 : f32 to vector<32x128xf32>
    %97 = arith.mulf %96, %95 : vector<32x128xf32>
    %98 = arith.addf %84, %97 : vector<32x128xf32>
    %99 = vector.broadcast %42 : f32 to vector<32x128xf32>
    %100 = arith.mulf %99, %95 : vector<32x128xf32>
    %101 = arith.addf %87, %100 : vector<32x128xf32>
    %102 = vector.broadcast %6 : f32 to vector<32x128xf32>
    %103 = arith.mulf %102, %58 : vector<32x128xf32>
    %104 = vector.broadcast %7 : f32 to vector<32x128xf32>
    %105 = arith.mulf %104, %61 : vector<32x128xf32>
    %106 = arith.addf %103, %105 : vector<32x128xf32>
    %107 = vector.broadcast %23 : f32 to vector<32x128xf32>
    %108 = arith.addf %106, %107 : vector<32x128xf32>
    %109 = math.tanh %108 : vector<32x128xf32>
    %110 = vector.broadcast %33 : f32 to vector<32x128xf32>
    %111 = arith.mulf %110, %109 : vector<32x128xf32>
    %112 = arith.addf %98, %111 : vector<32x128xf32>
    %113 = vector.broadcast %43 : f32 to vector<32x128xf32>
    %114 = arith.mulf %113, %109 : vector<32x128xf32>
    %115 = arith.addf %101, %114 : vector<32x128xf32>
    %116 = vector.broadcast %8 : f32 to vector<32x128xf32>
    %117 = arith.mulf %116, %58 : vector<32x128xf32>
    %118 = vector.broadcast %9 : f32 to vector<32x128xf32>
    %119 = arith.mulf %118, %61 : vector<32x128xf32>
    %120 = arith.addf %117, %119 : vector<32x128xf32>
    %121 = vector.broadcast %24 : f32 to vector<32x128xf32>
    %122 = arith.addf %120, %121 : vector<32x128xf32>
    %123 = math.tanh %122 : vector<32x128xf32>
    %124 = vector.broadcast %34 : f32 to vector<32x128xf32>
    %125 = arith.mulf %124, %123 : vector<32x128xf32>
    %126 = arith.addf %112, %125 : vector<32x128xf32>
    %127 = vector.broadcast %44 : f32 to vector<32x128xf32>
    %128 = arith.mulf %127, %123 : vector<32x128xf32>
    %129 = arith.addf %115, %128 : vector<32x128xf32>
    %130 = vector.broadcast %10 : f32 to vector<32x128xf32>
    %131 = arith.mulf %130, %58 : vector<32x128xf32>
    %132 = vector.broadcast %11 : f32 to vector<32x128xf32>
    %133 = arith.mulf %132, %61 : vector<32x128xf32>
    %134 = arith.addf %131, %133 : vector<32x128xf32>
    %135 = vector.broadcast %25 : f32 to vector<32x128xf32>
    %136 = arith.addf %134, %135 : vector<32x128xf32>
    %137 = math.tanh %136 : vector<32x128xf32>
    %138 = vector.broadcast %35 : f32 to vector<32x128xf32>
    %139 = arith.mulf %138, %137 : vector<32x128xf32>
    %140 = arith.addf %126, %139 : vector<32x128xf32>
    %141 = vector.broadcast %45 : f32 to vector<32x128xf32>
    %142 = arith.mulf %141, %137 : vector<32x128xf32>
    %143 = arith.addf %129, %142 : vector<32x128xf32>
    %144 = vector.broadcast %12 : f32 to vector<32x128xf32>
    %145 = arith.mulf %144, %58 : vector<32x128xf32>
    %146 = vector.broadcast %13 : f32 to vector<32x128xf32>
    %147 = arith.mulf %146, %61 : vector<32x128xf32>
    %148 = arith.addf %145, %147 : vector<32x128xf32>
    %149 = vector.broadcast %26 : f32 to vector<32x128xf32>
    %150 = arith.addf %148, %149 : vector<32x128xf32>
    %151 = math.tanh %150 : vector<32x128xf32>
    %152 = vector.broadcast %36 : f32 to vector<32x128xf32>
    %153 = arith.mulf %152, %151 : vector<32x128xf32>
    %154 = arith.addf %140, %153 : vector<32x128xf32>
    %155 = vector.broadcast %46 : f32 to vector<32x128xf32>
    %156 = arith.mulf %155, %151 : vector<32x128xf32>
    %157 = arith.addf %143, %156 : vector<32x128xf32>
    %158 = vector.broadcast %14 : f32 to vector<32x128xf32>
    %159 = arith.mulf %158, %58 : vector<32x128xf32>
    %160 = vector.broadcast %15 : f32 to vector<32x128xf32>
    %161 = arith.mulf %160, %61 : vector<32x128xf32>
    %162 = arith.addf %159, %161 : vector<32x128xf32>
    %163 = vector.broadcast %27 : f32 to vector<32x128xf32>
    %164 = arith.addf %162, %163 : vector<32x128xf32>
    %165 = math.tanh %164 : vector<32x128xf32>
    %166 = vector.broadcast %37 : f32 to vector<32x128xf32>
    %167 = arith.mulf %166, %165 : vector<32x128xf32>
    %168 = arith.addf %154, %167 : vector<32x128xf32>
    %169 = vector.broadcast %47 : f32 to vector<32x128xf32>
    %170 = arith.mulf %169, %165 : vector<32x128xf32>
    %171 = arith.addf %157, %170 : vector<32x128xf32>
    %172 = vector.broadcast %16 : f32 to vector<32x128xf32>
    %173 = arith.mulf %172, %58 : vector<32x128xf32>
    %174 = vector.broadcast %17 : f32 to vector<32x128xf32>
    %175 = arith.mulf %174, %61 : vector<32x128xf32>
    %176 = arith.addf %173, %175 : vector<32x128xf32>
    %177 = vector.broadcast %28 : f32 to vector<32x128xf32>
    %178 = arith.addf %176, %177 : vector<32x128xf32>
    %179 = math.tanh %178 : vector<32x128xf32>
    %180 = vector.broadcast %38 : f32 to vector<32x128xf32>
    %181 = arith.mulf %180, %179 : vector<32x128xf32>
    %182 = arith.addf %168, %181 : vector<32x128xf32>
    %183 = vector.broadcast %48 : f32 to vector<32x128xf32>
    %184 = arith.mulf %183, %179 : vector<32x128xf32>
    %185 = arith.addf %171, %184 : vector<32x128xf32>
    %186 = vector.broadcast %18 : f32 to vector<32x128xf32>
    %187 = arith.mulf %186, %58 : vector<32x128xf32>
    %188 = vector.broadcast %19 : f32 to vector<32x128xf32>
    %189 = arith.mulf %188, %61 : vector<32x128xf32>
    %190 = arith.addf %187, %189 : vector<32x128xf32>
    %191 = vector.broadcast %29 : f32 to vector<32x128xf32>
    %192 = arith.addf %190, %191 : vector<32x128xf32>
    %193 = math.tanh %192 : vector<32x128xf32>
    %194 = vector.broadcast %39 : f32 to vector<32x128xf32>
    %195 = arith.mulf %194, %193 : vector<32x128xf32>
    %196 = arith.addf %182, %195 : vector<32x128xf32>
    %197 = vector.broadcast %49 : f32 to vector<32x128xf32>
    %198 = arith.mulf %197, %193 : vector<32x128xf32>
    %199 = arith.addf %185, %198 : vector<32x128xf32>
    %200 = vector.broadcast %50 : f32 to vector<32x128xf32>
    %201 = arith.addf %196, %200 : vector<32x128xf32>
    %c0_87 = arith.constant 0 : index
    %202 = arith.index_cast %55 : i32 to index
    %c0_88 = arith.constant 0 : index
    %203 = vector.load %arg6[%c0_87, %202, %c0_88] : memref<2x32x128xf32, #tpu.memory_space<vmem>>, vector<1x32x128xf32>
    %204 = vector.shape_cast %203 : vector<1x32x128xf32> to vector<32x128xf32>
    %205 = vector.shape_cast %201 : vector<32x128xf32> to vector<1x32x128xf32>
    tpu.vector_store %arg6[%c0_87, %202, %c0_88], %205 {strides = array<i32>} : memref<2x32x128xf32, #tpu.memory_space<vmem>>, vector<1x32x128xf32>,
    %206 = vector.broadcast %51 : f32 to vector<32x128xf32>
    %207 = arith.addf %199, %206 : vector<32x128xf32>
    %c1_89 = arith.constant 1 : index
    %208 = arith.index_cast %55 : i32 to index
    %c0_90 = arith.constant 0 : index
    %209 = vector.load %arg6[%c1_89, %208, %c0_90] : memref<2x32x128xf32, #tpu.memory_space<vmem>>, vector<1x32x128xf32>
    %210 = vector.shape_cast %209 : vector<1x32x128xf32> to vector<32x128xf32>
    %211 = vector.shape_cast %207 : vector<32x128xf32> to vector<1x32x128xf32>
    tpu.vector_store %arg6[%c1_89, %208, %c0_90], %211 {strides = array<i32>} : memref<2x32x128xf32, #tpu.memory_space<vmem>>, vector<1x32x128xf32>,
    %c1_i32_91 = arith.constant 1 : i32
    return
  }
  func.func @transform_0(%arg0: i32) -> (i32, i32, i32) {
    %c0_i32 = arith.constant 0 : i32
    %c0_i32_0 = arith.constant 0 : i32
    %c0_i32_1 = arith.constant 0 : i32
    return %c0_i32, %arg0, %c0_i32_0 : i32, i32, i32
  }
  func.func @transform_1(%arg0: i32) -> (i32, i32) {
    %c0_i32 = arith.constant 0 : i32
    %c0_i32_0 = arith.constant 0 : i32
    %c0_i32_1 = arith.constant 0 : i32
    return %c0_i32, %c0_i32_0 : i32, i32
  }
  func.func @transform_2(%arg0: i32) -> i32 {
    %c0_i32 = arith.constant 0 : i32
    %c0_i32_0 = arith.constant 0 : i32
    return %c0_i32 : i32
  }
  func.func @transform_3(%arg0: i32) -> (i32, i32) {
    %c0_i32 = arith.constant 0 : i32
    %c0_i32_0 = arith.constant 0 : i32
    %c0_i32_1 = arith.constant 0 : i32
    return %c0_i32, %c0_i32_0 : i32, i32
  }
  func.func @transform_4(%arg0: i32) -> i32 {
    %c0_i32 = arith.constant 0 : i32
    %c0_i32_0 = arith.constant 0 : i32
    return %c0_i32 : i32
  }
  func.func @transform_5(%arg0: i32) -> (i32, i32, i32) {
    %c0_i32 = arith.constant 0 : i32
    %c0_i32_0 = arith.constant 0 : i32
    %c0_i32_1 = arith.constant 0 : i32
    return %c0_i32, %arg0, %c0_i32_0 : i32, i32, i32
  }
}

</mosaic_0001>

<bundles_post_ra>
// kernel: _forward_impl.1
= control target key start
LH: loop header
LB: loop body
LE: loop exit
PB: predicated region body
PF: predicated region fallthrough
CT: control target
= control target key end

     0   :  { %10 = vsyncpa [#allocation3], 0  ;;  %s1614_s0 = inlined_call_operand.vmem [shape: f32[2,32,128], index: 0, kind: input, shape index: {}]   ;;  %s1615_s1 = inlined_call_operand.vmem [shape: f32[10,2], index: 1, kind: input, shape index: {}]   ;;  %s1616_s2 = inlined_call_operand.vmem [shape: f32[10], index: 2, kind: input, shape index: {}]   ;;  %s1617_s3 = inlined_call_operand.vmem [shape: f32[2,10], index: 3, kind: input, shape index: {}]   ;;  %s1618_s4 = inlined_call_operand.vmem [shape: f32[2], index: 4, kind: input, shape index: {}]   ;;  %s1619_s5 = inlined_call_operand.vmem [shape: f32[2,32,128], index: 5, kind: output, shape index: {}]  }
   0x1   :  { %11 = vsyncpa [#allocation5], 0  ;;  %s31_s20 = sshll.u32 %s1616_s2, 4  ;;  %s32_s20 = int_to_ptr.vmem [resolvable:$true] %s31_s20 }
   0x2   :  { %12 = vsyncpa [#allocation8], 0  ;;  %s19_s23 = sshll.u32 %s1615_s1, 4  ;;  %s758_s24 = smov [#allocation4]   ;;  %s20_s23 = int_to_ptr.vmem [resolvable:$true] %s19_s23 }
   0x3   :  { %34 = dma.vmem_to_smem %s32_s20, 16, %s758_s24, [#allocation5]  }
   0x4   :  { %s759_s25 = smov [#allocation2]   ;;  %s760_s26 = smov 128  }
   0x5   :  { %s761_s27 = smov 8   ;;  %s40_s30 = sshll.u32 %s1617_s3, 4  ;;  %s41_s30 = int_to_ptr.vmem [resolvable:$true] %s40_s30 }
   0x6   :  { %25 = dma.vmem_to_smem %s20_s23, 256, %s759_s25, [#allocation3], %s760_s26, %s760_s26, %s761_s27  }
   0x7   :  { %s49_s7 = sshll.u32 %s1618_s4, 4  ;;  %s762_s8 = smov [#allocation6]   ;;  %s50_s7 = int_to_ptr.vmem [resolvable:$true] %s49_s7 }
   0x8   :  { %43 = dma.vmem_to_smem %s41_s30, 32, %s762_s8, [#allocation5]  }
   0x9   :  { %s763_s1 = smov [#allocation7]  }
   0xa   :  { %52 = dma.vmem_to_smem %s50_s7, 16, %s763_s1, [#allocation8]  }
   0xb   :  { %752 = dma.done.wait [#allocation3], 256  }
   0xc   :  { %753 = vsyncadd [#allocation3], 4294967040 }
   0xd   :  { %754 = dma.done.wait [#allocation5], 48  }
   0xe   :  { %755 = vsyncadd [#allocation5], 4294967248 }
   0xf   :  { %756 = dma.done.wait [#allocation8], 16  }
  0x10   :  { %757 = vsyncadd [#allocation8], 4294967280 }
  0x11   :  { %69 = sfence }
  0x12   :  { %s70_s9 = sld [smem:[#allocation2]]  ;;  %v809_v0 = vld [vmem:[%s1614_s0] sm:$0xff]  ;;  %v814_v1 = vld [vmem:[%s1614_s0 + $0x8] sm:$0xff]  ;;  %v829_v4 = vld [vmem:[%s1614_s0 + $0x10] sm:$0xff] }
  0x13   :  { %s562_s10 = sld [smem:[#allocation2 + $0x1]]  ;;  %v819_v2 = vld [vmem:[%s1614_s0 + $0x20] sm:$0xff]  ;;  %v824_v3 = vld [vmem:[%s1614_s0 + $0x28] sm:$0xff]  ;;  %v836_v6 = vld [vmem:[%s1614_s0 + $0x30] sm:$0xff] }
  0x14   :  { %s563_s3 = sld [smem:[#allocation2 + $0x80]] }
  0x15   :  { %s564_s11 = sld [smem:[#allocation2 + $0x81]] }
  0x16   :  { %s565_s12 = sld [smem:[#allocation2 + $0x100]] }
  0x17   :  { %s566_s16 = sld [smem:[#allocation2 + $0x101]] }
  0x18   :  { %s567_s23 = sld [smem:[#allocation2 + $0x180]]  ;;  %v831_v5 = vstv %s70_s9 }
  0x19   :  { %s838_s26 = sld [smem:[#allocation2 + $0x181]]  ;;  %v133_v7 = vmul.f32 %v831_v5, %v809_v0  ;;  %v842_v8 = vstv %s562_s10  ;;  %v134_v9 = vmul.f32 %v831_v5, %v814_v1  ;;  %v856_v13 = vmul.f32 %v831_v5, %v829_v4 }
  0x1a   :  { %s846_s27 = sld [smem:[#allocation2 + $0x200]]  ;;  %v138_v10 = vmul.f32 %v819_v2, %v842_v8  ;;  %v850_v11 = vstv %s563_s3  ;;  %v139_v12 = vmul.f32 %v824_v3, %v842_v8  ;;  %v868_v17 = vmul.f32 %v836_v6, %v842_v8 }
  0x1b   :  { %s858_s28 = sld [smem:[#allocation2 + $0x201]]  ;;  %v166_v14 = vmul.f32 %v850_v11, %v809_v0  ;;  %v862_v15 = vstv %s564_s11  ;;  %v167_v16 = vmul.f32 %v850_v11, %v814_v1 }
  0x1c   :  { %s870_s29 = sld [smem:[#allocation2 + $0x280]]  ;;  %v872_v18 = vadd.f32 %v138_v10, %v133_v7  ;;  %v171_v19 = vmul.f32 %v819_v2, %v862_v15  ;;  %v876_v20 = vstv %s565_s12  ;;  %v878_v21 = vadd.f32 %v139_v12, %v134_v9 }
  0x1d   :  { %s880_s30 = sld [smem:[#allocation2 + $0x281]]  ;;  %v207_v22 = vmul.f32 %v876_v20, %v809_v0  ;;  %v884_v23 = vstv %s566_s16  ;;  %v172_v24 = vmul.f32 %v824_v3, %v862_v15  ;;  %v208_v25 = vmul.f32 %v876_v20, %v814_v1 }
  0x1e   :  { %1644 = vst [vmem:[#allocation12_spill] sm:$0xff] %v884_v23  ;;  %s890_s6 = sld [smem:[#allocation2 + $0x300]]  ;;  %v892_v26 = vadd.f32 %v171_v19, %v166_v14  ;;  %v212_v27 = vmul.f32 %v819_v2, %v884_v23  ;;  %v896_v28 = vstv %s567_s23  ;;  %v213_v29 = vmul.f32 %v824_v3, %v884_v23 }
  0x1f   :  { %s900_s2 = sld [smem:[#allocation2 + $0x301]]  ;;  %v248_v30 = vmul.f32 %v896_v28, %v809_v0  ;;  %v905_v31 = vstv %s838_s26  ;;  %v907_v32 = vadd.f32 %v172_v24, %v167_v16  ;;  %v249_v33 = vmul.f32 %v896_v28, %v814_v1 }
  0x20   :  { %s911_s7 = sld [smem:[#allocation2 + $0x380]]  ;;  %v913_v34 = vadd.f32 %v212_v27, %v207_v22  ;;  %v253_v35 = vmul.f32 %v819_v2, %v905_v31  ;;  %v918_v36 = vstv %s846_s27  ;;  %v920_v37 = vadd.f32 %v213_v29, %v208_v25 }
  0x21   :  { %s922_s8 = sld [smem:[#allocation2 + $0x381]]  ;;  %v289_v38 = vmul.f32 %v918_v36, %v809_v0  ;;  %v927_v39 = vstv %s858_s28  ;;  %v254_v40 = vmul.f32 %v824_v3, %v905_v31  ;;  %v290_v41 = vmul.f32 %v918_v36, %v814_v1 }
  0x22   :  { %s933_s1 = sld [smem:[#allocation2 + $0x400]]  ;;  %v935_v42 = vadd.f32 %v253_v35, %v248_v30  ;;  %v294_v43 = vmul.f32 %v819_v2, %v927_v39  ;;  %v940_v44 = vstv %s870_s29  ;;  %v295_v45 = vmul.f32 %v824_v3, %v927_v39 }
  0x23   :  { %s944_s9 = sld [smem:[#allocation2 + $0x401]]  ;;  %v330_v46 = vmul.f32 %v940_v44, %v809_v0  ;;  %v949_v47 = vstv %s880_s30  ;;  %v951_v48 = vadd.f32 %v254_v40, %v249_v33  ;;  %v331_v49 = vmul.f32 %v940_v44, %v814_v1 }
  0x24   :  { %s955_s10 = sld [smem:[#allocation2 + $0x480]]  ;;  %v957_v50 = vadd.f32 %v294_v43, %v289_v38  ;;  %v335_v51 = vmul.f32 %v819_v2, %v949_v47  ;;  %v962_v52 = vstv %s890_s6  ;;  %v964_v53 = vadd.f32 %v295_v45, %v290_v41 }
  0x25   :  { %s966_s3 = sld [smem:[#allocation2 + $0x481]]  ;;  %v371_v54 = vmul.f32 %v962_v52, %v809_v0  ;;  %v971_v55 = vstv %s900_s2  ;;  %v336_v56 = vmul.f32 %v824_v3, %v949_v47  ;;  %v372_v57 = vmul.f32 %v962_v52, %v814_v1 }
  0x26   :  { %s977_s11 = sld [smem:[#allocation4]]  ;;  %v339_v58 = vadd.f32 %v335_v51, %v330_v46  ;;  %v376_v59 = vmul.f32 %v819_v2, %v971_v55  ;;  %v982_v60 = vstv %s911_s7  ;;  %v377_v61 = vmul.f32 %v824_v3, %v971_v55 }
  0x27   :  { %s986_s12 = sld [smem:[#allocation4 + $0x1]]  ;;  %v412_v62 = vmul.f32 %v982_v60, %v809_v0  ;;  %v991_v63 = vstv %s922_s8  ;;  %v340_v7 = vadd.f32 %v336_v56, %v331_v49  ;;  %v413_v9 = vmul.f32 %v982_v60, %v814_v1 }
  0x28   :  { %s995_s13 = sld [smem:[#allocation4 + $0x2]]  ;;  %v380_v10 = vadd.f32 %v376_v59, %v371_v54  ;;  %v417_v12 = vmul.f32 %v819_v2, %v991_v63  ;;  %v1000_v14 = vstv %s933_s1  ;;  %v381_v16 = vadd.f32 %v377_v61, %v372_v57 }
  0x29   :  { %s1002_s14 = sld [smem:[#allocation4 + $0x3]]  ;;  %v453_v19 = vmul.f32 %v1000_v14, %v809_v0  ;;  %v1007_v22 = vstv %s944_s9  ;;  %v418_v24 = vmul.f32 %v824_v3, %v991_v63  ;;  %v454_v25 = vmul.f32 %v1000_v14, %v814_v1 }
  0x2a   :  { %s1013_s4 = sld [smem:[#allocation4 + $0x4]]  ;;  %v421_v27 = vadd.f32 %v417_v12, %v412_v62  ;;  %v458_v29 = vmul.f32 %v819_v2, %v1007_v22  ;;  %v1018_v30 = vstv %s955_s10  ;;  %v459_v33 = vmul.f32 %v824_v3, %v1007_v22 }
  0x2b   :  { %s1022_s15 = sld [smem:[#allocation4 + $0x5]]  ;;  %v494_v35 = vmul.f32 %v1018_v30, %v809_v0  ;;  %v1027_v38 = vstv %s966_s3  ;;  %v422_v40 = vadd.f32 %v418_v24, %v413_v9  ;;  %v495_v41 = vmul.f32 %v1018_v30, %v814_v1 }
  0x2c   :  { %s1031_s16 = sld [smem:[#allocation4 + $0x6]]  ;;  %v1034_v43 = vstv %s977_s11  ;;  %v462_v45 = vadd.f32 %v458_v29, %v453_v19  ;;  %v499_v46 = vmul.f32 %v819_v2, %v1027_v38  ;;  %v463_v49 = vadd.f32 %v459_v33, %v454_v25 }
  0x2d   :  { %1645 = vst [vmem:[#allocation13_spill] sm:$0xff] %v1034_v43  ;;  %s1038_s17 = sld [smem:[#allocation4 + $0x7]]  ;;  %v147_v0 = vadd.f32 %v1034_v43, %v872_v18  ;;  %v1043_v51 = vstv %s986_s12  ;;  %v1047_v1 = vadd.f32 %v1034_v43, %v878_v21  ;;  %v500_v54 = vmul.f32 %v824_v3, %v1027_v38 }
  0x2e   :  { %1646 = vst [vmem:[#allocation14_spill] sm:$0xff] %v1043_v51  ;;  %s1051_s18 = sld [smem:[#allocation4 + $0x8]]  ;;  %v180_v2 = vadd.f32 %v1043_v51, %v892_v26  ;;  %v1056_v56 = vstv %s995_s13  ;;  %v503_v57 = vadd.f32 %v499_v46, %v494_v35  ;;  %v1060_v18 = vadd.f32 %v1043_v51, %v907_v32 }
  0x2f   :  { %1647 = vst [vmem:[#allocation15_spill] sm:$0xff] %v1056_v56  ;;  %s1062_s19 = sld [smem:[#allocation4 + $0x9]]  ;;  %624 = vtanh.f32 %v147_v0  ;;  %v221_v21 = vadd.f32 %v1056_v56, %v913_v34  ;;  %v1067_v3 = vstv %s1002_s14  ;;  %v1071_v26 = vadd.f32 %v1056_v56, %v920_v37 }
  0x30   :  { %s1073_s20 = sld [smem:[#allocation6]]  ;;  %626 = vtanh.f32 %v180_v2  ;;  %v262_v32 = vadd.f32 %v1067_v3, %v935_v42  ;;  %v1078_v59 = vstv %s1013_s4  ;;  %v1082_v61 = vadd.f32 %v1067_v3, %v951_v48 }
  0x31   :  { %s1084_s21 = sld [smem:[#allocation6 + $0x1]]  ;;  %628 = vtanh.f32 %v221_v21  ;;  %v303_v34 = vadd.f32 %v1078_v59, %v957_v50  ;;  %v1089_v37 = vstv %s1022_s15  ;;  %v1093_v62 = vadd.f32 %v1078_v59, %v964_v53 }
  0x32   :  { %s1095_s22 = sld [smem:[#allocation6 + $0x2]]  ;;  %630 = vtanh.f32 %v262_v32  ;;  %v344_v42 = vadd.f32 %v1089_v37, %v339_v58  ;;  %v1099_v48 = vstv %s1031_s16  ;;  %v1102_v9 = vadd.f32 %v1089_v37, %v340_v7 }
  0x33   :  { %s1104_s23 = sld [smem:[#allocation6 + $0x3]]  ;;  %632 = vtanh.f32 %v303_v34  ;;  %v385_v50 = vadd.f32 %v1099_v48, %v380_v10  ;;  %v1108_v12 = vstv %s1038_s17  ;;  %v1111_v53 = vadd.f32 %v1099_v48, %v381_v16 }
  0x34   :  { %s1113_s24 = sld [smem:[#allocation6 + $0x4]]  ;;  %634 = vtanh.f32 %v344_v42  ;;  %v426_v58 = vadd.f32 %v1108_v12, %v421_v27  ;;  %v1117_v19 = vstv %s1051_s18  ;;  %v1120_v7 = vadd.f32 %v1108_v12, %v422_v40 }
  0x35   :  { %v1122_v24 = vpop.eup %624  ;;  %s1124_s25 = sld [smem:[#allocation6 + $0x5]]  ;;  %636 = vtanh.f32 %v385_v50  ;;  %v467_v10 = vadd.f32 %v1117_v19, %v462_v45  ;;  %v1128_v16 = vstv %s1062_s19  ;;  %v1131_v25 = vadd.f32 %v1117_v19, %v463_v49 }
  0x36   :  { %1648 = vst [vmem:[#allocation16_spill] sm:$0xff] %v1122_v24  ;;  %v1133_v27 = vpop.eup %626  ;;  %s1135_s26 = sld [smem:[#allocation6 + $0x6]]  ;;  %v1138_v29 = vstv %s1073_s20  ;;  %638 = vtanh.f32 %v426_v58  ;;  %v508_v33 = vadd.f32 %v1128_v16, %v503_v57  ;;  %v504_v35 = vadd.f32 %v500_v54, %v495_v41 }
  0x37   :  { %1649 = vst [vmem:[#allocation17_spill] sm:$0xff] %v1133_v27  ;;  %v1141_v40 = vpop.eup %628  ;;  %s1143_s27 = sld [smem:[#allocation6 + $0x7]]  ;;  %v156_v45 = vmul.f32 %v1122_v24, %v1138_v29  ;;  %v1148_v46 = vstv %s1084_s21  ;;  %640 = vtanh.f32 %v467_v10  ;;  %v144_v49 = vadd.f32 %v868_v17, %v856_v13 }
  0x38   :  { %1650 = vst [vmem:[#allocation18_spill] sm:$0xff] %v1141_v40  ;;  %v1152_v0 = vpop.eup %630  ;;  %s1154_s28 = sld [smem:[#allocation6 + $0x8]]  ;;  %v189_v41 = vmul.f32 %v1133_v27, %v1148_v46  ;;  %v1159_v54 = vstv %s1095_s22  ;;  %642 = vtanh.f32 %v508_v33  ;;  %v509_v2 = vadd.f32 %v1128_v16, %v504_v35 }
  0x39   :  { %1651 = vst [vmem:[#allocation19_spill] sm:$0xff] %v1152_v0  ;;  %v1162_v57 = vpop.eup %632  ;;  %s1164_s29 = sld [smem:[#allocation6 + $0x9]]  ;;  %v230_v13 = vmul.f32 %v1141_v40, %v1159_v54  ;;  %v1169_v17 = vstv %s1104_s23  ;;  %644 = vtanh.f32 %v1047_v1  ;;  %v149_v21 = vadd.f32 %v1034_v43, %v144_v49 }
  0x3a   :  { %1652 = vst [vmem:[#allocation20_spill] sm:$0xff] %v1162_v57  ;;  %v1173_v32 = vpop.eup %634  ;;  %s1175_s30 = sld [smem:[#allocation7]]  ;;  %v193_v34 = vadd.f32 %v189_v41, %v156_v45  ;;  %v271_v42 = vmul.f32 %v1152_v0, %v1169_v17  ;;  %v1180_v50 = vstv %s1113_s24  ;;  %646 = vtanh.f32 %v1060_v18 }
  0x3b   :  { %1653 = vst [vmem:[#allocation21_spill] sm:$0xff] %v1173_v32  ;;  %v1183_v58 = vpop.eup %636  ;;  %v312_v1 = vmul.f32 %v1162_v57, %v1180_v50  ;;  %v1188_v10 = vstv %s1124_s25  ;;  %648 = vtanh.f32 %v1071_v26  ;;  %v168_v33 = vmul.f32 %v850_v11, %v829_v4  ;;  %s1389_s3 = sld [smem:[#allocation6 + $0x80]] }
  0x3c   :  { %1654 = vst [vmem:[#allocation22_spill] sm:$0xff] %v1183_v58  ;;  %v1193_v35 = vpop.eup %638  ;;  %v234_v45 = vadd.f32 %v230_v13, %v193_v34  ;;  %v353_v18 = vmul.f32 %v1173_v32, %v1188_v10  ;;  %v1198_v49 = vstv %s1135_s26  ;;  %650 = vtanh.f32 %v1082_v61  ;;  %s1402_s11 = sld [smem:[#allocation6 + $0x81]] }
  0x3d   :  { %1655 = vst [vmem:[#allocation23_spill] sm:$0xff] %v1193_v35  ;;  %v1201_v41 = vpop.eup %640  ;;  %v394_v57 = vmul.f32 %v1183_v58, %v1198_v49  ;;  %v1206_v26 = vstv %s1143_s27  ;;  %652 = vtanh.f32 %v1093_v62  ;;  %v173_v13 = vmul.f32 %v836_v6, %v862_v15  ;;  %s1408_s12 = sld [smem:[#allocation6 + $0x82]] }
  0x3e   :  { %1656 = vst [vmem:[#allocation24_spill] sm:$0xff] %v1201_v41  ;;  %v1211_v34 = vpop.eup %642  ;;  %v275_v32 = vadd.f32 %v271_v42, %v234_v45  ;;  %v435_v0 = vmul.f32 %v1193_v35, %v1206_v26  ;;  %v1216_v61 = vstv %s1154_s28  ;;  %654 = vtanh.f32 %v1102_v9  ;;  %s1419_s13 = sld [smem:[#allocation6 + $0x83]] }
  0x3f   :  { %1657 = vst [vmem:[#allocation25_spill] sm:$0xff] %v1211_v34  ;;  %v1219_v40 = vpop.eup %644  ;;  %v476_v58 = vmul.f32 %v1201_v41, %v1216_v61  ;;  %v1224_v27 = vstv %s1164_s29  ;;  %656 = vtanh.f32 %v1111_v53  ;;  %v177_v62 = vadd.f32 %v173_v13, %v168_v33  ;;  %s1425_s14 = sld [smem:[#allocation6 + $0x84]] }
  0x40   :  { %1658 = vst [vmem:[#allocation26_spill] sm:$0xff] %v1219_v40  ;;  %v1227_v24 = vpop.eup %646  ;;  %v316_v42 = vadd.f32 %v312_v1, %v275_v32  ;;  %v517_v45 = vmul.f32 %v1211_v34, %v1224_v27  ;;  %v1232_v35 = vstv %s1175_s30  ;;  %v157_v9 = vmul.f32 %v1219_v40, %v1138_v29  ;;  %s1434_s4 = sld [smem:[#allocation6 + $0x85]] }
  0x41   :  { %1659 = vst [vmem:[#allocation27_spill] sm:$0xff] %v1227_v24  ;;  %v1236_v43 = vpop.eup %648  ;;  %v190_v41 = vmul.f32 %v1227_v24, %v1148_v46  ;;  %658 = vtanh.f32 %v1120_v7  ;;  %v182_v53 = vadd.f32 %v1043_v51, %v177_v62  ;;  %v209_v32 = vmul.f32 %v876_v20, %v829_v4  ;;  %s1439_s15 = sld [smem:[#allocation6 + $0x86]] }
  0x42   :  { %1660 = vst [vmem:[#allocation28_spill] sm:$0xff] %v1236_v43  ;;  %v1244_v1 = vpop.eup %650  ;;  %v357_v33 = vadd.f32 %v353_v18, %v316_v42  ;;  %v231_v13 = vmul.f32 %v1236_v43, %v1159_v54  ;;  %660 = vtanh.f32 %v1131_v25  ;;  %v214_v34 = vmul.f32 %v836_v6, %v884_v23  ;;  %s1447_s16 = sld [smem:[#allocation6 + $0x87]] }
  0x43   :  { %1661 = vst [vmem:[#allocation29_spill] sm:$0xff] %v1244_v1  ;;  %v1251_v40 = vpop.eup %652  ;;  %v194_v24 = vadd.f32 %v190_v41, %v157_v9  ;;  %v272_v7 = vmul.f32 %v1244_v1, %v1169_v17  ;;  %662 = vtanh.f32 %v509_v2  ;;  %v250_v62 = vmul.f32 %v896_v28, %v829_v4  ;;  %s1464_s19 = sld [smem:[#allocation6 + $0x88]] }
  0x44   :  { %1662 = vst [vmem:[#allocation30_spill] sm:$0xff] %v1251_v40  ;;  %v1257_v51 = vpop.eup %654  ;;  %v398_v18 = vadd.f32 %v394_v57, %v357_v33  ;;  %v313_v42 = vmul.f32 %v1251_v40, %v1180_v50  ;;  %664 = vtanh.f32 %v149_v21  ;;  %v218_v25 = vadd.f32 %v214_v34, %v209_v32  ;;  %s1480_s20 = sld [smem:[#allocation6 + $0x89]] }
  0x45   :  { %1663 = vst [vmem:[#allocation31_spill] sm:$0xff] %v1257_v51  ;;  %v1261_v43 = vpop.eup %656  ;;  %v235_v23 = vadd.f32 %v231_v13, %v194_v24  ;;  %v354_v41 = vmul.f32 %v1257_v51, %v1188_v10  ;;  %666 = vtanh.f32 %v182_v53  ;;  %v255_v2 = vmul.f32 %v836_v6, %v905_v31  ;;  %s1517_s21 = sld [smem:[#allocation7 + $0x1]] }
  0x46   :  { %1664 = vst [vmem:[#allocation32_spill] sm:$0xff] %v1261_v43  ;;  %v439_v9 = vadd.f32 %v435_v0, %v398_v18  ;;  %v395_v1 = vmul.f32 %v1261_v43, %v1198_v49  ;;  %v223_v57 = vadd.f32 %v1056_v56, %v218_v25  ;;  %v291_v21 = vmul.f32 %v918_v36, %v829_v4 }
  0x47   :  { %v1272_v34 = vpop.eup %658  ;;  %v276_v32 = vadd.f32 %v272_v7, %v235_v23  ;;  %v259_v24 = vadd.f32 %v255_v2, %v250_v62  ;;  %v296_v33 = vmul.f32 %v836_v6, %v927_v39  ;;  %v332_v53 = vmul.f32 %v940_v44, %v829_v4 }
  0x48   :  { %1665 = vst [vmem:[#allocation33_spill] sm:$0xff] %v1272_v34  ;;  %v1278_v13 = vpop.eup %660  ;;  %v480_v0 = vadd.f32 %v476_v58, %v439_v9  ;;  %v436_v18 = vmul.f32 %v1272_v34, %v1206_v26  ;;  %668 = vtanh.f32 %v223_v57  ;;  %v337_v25 = vmul.f32 %v836_v6, %v949_v47 }
  0x49   :  { %1666 = vst [vmem:[#allocation34_spill] sm:$0xff] %v1278_v13  ;;  %v1284_v43 = vpop.eup %662  ;;  %v317_v23 = vadd.f32 %v313_v42, %v276_v32  ;;  %v477_v7 = vmul.f32 %v1278_v13, %v1216_v61  ;;  %v264_v62 = vadd.f32 %v1067_v3, %v259_v24  ;;  %v300_v2 = vadd.f32 %v296_v33, %v291_v21 }
  0x4a   :  { %1667 = vst [vmem:[#allocation35_spill] sm:$0xff] %v1284_v43  ;;  %v1289_v51 = vpop.eup %664  ;;  %v521_v40 = vadd.f32 %v517_v45, %v480_v0  ;;  %v518_v58 = vmul.f32 %v1284_v43, %v1224_v27  ;;  %v341_v9 = vadd.f32 %v337_v25, %v332_v53  ;;  %v373_v57 = vmul.f32 %v962_v52, %v829_v4  ;;  %v1329_v43 = vld [vmem:[%s1614_s0 + $0x38] sm:$0xff] }
  0x4b   :  { %v1295_v34 = vpop.eup %666  ;;  %v358_v56 = vadd.f32 %v354_v41, %v317_v23  ;;  %v158_v42 = vmul.f32 %v1289_v51, %v1138_v29  ;;  %670 = vtanh.f32 %v264_v62  ;;  %v305_v32 = vadd.f32 %v1078_v59, %v300_v2 }
  0x4c   :  { %v535_v21 = vadd.f32 %v1232_v35, %v521_v40  ;;  %v191_v45 = vmul.f32 %v1295_v34, %v1148_v46  ;;  %v346_v24 = vadd.f32 %v1089_v37, %v341_v9  ;;  %v378_v33 = vmul.f32 %v836_v6, %v971_v55  ;;  %v1313_v40 = vld [vmem:[%s1614_s0 + $0x18] sm:$0xff] }
  0x4d   :  { %v399_v53 = vadd.f32 %v395_v1, %v358_v56  ;;  %672 = vtanh.f32 %v305_v32  ;;  %v414_v41 = vmul.f32 %v982_v60, %v829_v4  ;;  %v419_v0 = vmul.f32 %v836_v6, %v991_v63 }
  0x4e   :  { %v1315_v25 = vpop.eup %668  ;;  %539 = vst [vmem:[%s1619_s5] sm:$0xff] %v535_v21  ;;  %v195_v23 = vadd.f32 %v191_v45, %v158_v42  ;;  %674 = vtanh.f32 %v346_v24  ;;  %v382_v56 = vadd.f32 %v378_v33, %v373_v57  ;;  %v455_v1 = vmul.f32 %v1000_v14, %v829_v4 }
  0x4f   :  { %v440_v62 = vadd.f32 %v436_v18, %v399_v53  ;;  %v232_v2 = vmul.f32 %v1315_v25, %v1159_v54  ;;  %v423_v9 = vadd.f32 %v419_v0, %v414_v41  ;;  %v460_v32 = vmul.f32 %v836_v6, %v1007_v22 }
  0x50   :  { %v387_v42 = vadd.f32 %v1099_v48, %v382_v56  ;;  %v496_v57 = vmul.f32 %v1018_v30, %v829_v4  ;;  %v501_v18 = vmul.f32 %v836_v6, %v1027_v38  ;;  %v136_v21 = vmul.f32 %v831_v5, %v1313_v40 }
  0x51   :  { %v1338_v45 = vpop.eup %670  ;;  %v481_v24 = vadd.f32 %v477_v7, %v440_v62  ;;  %v236_v33 = vadd.f32 %v232_v2, %v195_v23  ;;  %v428_v53 = vadd.f32 %v1108_v12, %v423_v9  ;;  %v464_v41 = vadd.f32 %v460_v32, %v455_v1 }
  0x52   :  { %v273_v0 = vmul.f32 %v1338_v45, %v1169_v17  ;;  %676 = vtanh.f32 %v387_v42  ;;  %v505_v56 = vadd.f32 %v501_v18, %v496_v57  ;;  %v141_v4 = vmul.f32 %v1329_v43, %v842_v8 }
  0x53   :  { %v1345_v13 = vpop.eup %672  ;;  %v522_v6 = vadd.f32 %v518_v58, %v481_v24  ;;  %678 = vtanh.f32 %v428_v53  ;;  %v469_v5 = vadd.f32 %v1117_v19, %v464_v41  ;;  %v169_v7 = vmul.f32 %v850_v11, %v1313_v40  ;;  %v1668_v11 = vld [vmem:[#allocation13_spill] sm:$0xff]  ;;  %v1669_v24 = vld [vmem:[#allocation12_spill] sm:$0xff] }
  0x54   :  { %v1350_v23 = vpop.eup %674  ;;  %v277_v1 = vadd.f32 %v273_v0, %v236_v33  ;;  %v314_v62 = vmul.f32 %v1345_v13, %v1180_v50  ;;  %v510_v2 = vadd.f32 %v1128_v16, %v505_v56  ;;  %v145_v9 = vadd.f32 %v141_v4, %v136_v21 }
  0x55   :  { %v536_v8 = vadd.f32 %v1232_v35, %v522_v6  ;;  %v355_v58 = vmul.f32 %v1350_v23, %v1188_v10  ;;  %680 = vtanh.f32 %v469_v5  ;;  %v174_v32 = vmul.f32 %v1329_v43, %v862_v15  ;;  %v1670_v5 = vld [vmem:[#allocation14_spill] sm:$0xff] }
  0x56   :  { %v318_v42 = vadd.f32 %v314_v62, %v277_v1  ;;  %682 = vtanh.f32 %v510_v2  ;;  %v150_v57 = vadd.f32 %v1668_v11, %v145_v9  ;;  %v210_v18 = vmul.f32 %v876_v20, %v1313_v40 }
  0x57   :  { %540 = vst [vmem:[%s1619_s5 + $0x8] sm:$0xff] %v536_v8  ;;  %v178_v21 = vadd.f32 %v174_v32, %v169_v7  ;;  %v215_v33 = vmul.f32 %v1329_v43, %v1669_v24  ;;  %v251_v53 = vmul.f32 %v896_v28, %v1313_v40  ;;  %v256_v15 = vmul.f32 %v1329_v43, %v905_v31  ;;  %v1671_v8 = vld [vmem:[#allocation15_spill] sm:$0xff] }
  0x58   :  { %v1372_v41 = vpop.eup %676  ;;  %v359_v0 = vadd.f32 %v355_v58, %v318_v42  ;;  %684 = vtanh.f32 %v150_v57  ;;  %v292_v20 = vmul.f32 %v918_v36, %v1313_v40  ;;  %v297_v56 = vmul.f32 %v1329_v43, %v927_v39 }
  0x59   :  { %v1378_v4 = vpop.eup %678  ;;  %v396_v6 = vmul.f32 %v1372_v41, %v1198_v49  ;;  %v183_v28 = vadd.f32 %v1670_v5, %v178_v21  ;;  %v219_v7 = vadd.f32 %v215_v33, %v210_v18  ;;  %v260_v1 = vadd.f32 %v256_v15, %v251_v53 }
  0x5a   :  { %v437_v31 = vmul.f32 %v1378_v4, %v1206_v26  ;;  %v301_v62 = vadd.f32 %v297_v56, %v292_v20  ;;  %v333_v2 = vmul.f32 %v940_v44, %v1313_v40  ;;  %v338_v36 = vmul.f32 %v1329_v43, %v949_v47 }
  0x5b   :  { %v1391_v39 = vpop.eup %680  ;;  %v400_v9 = vadd.f32 %v396_v6, %v359_v0  ;;  %686 = vtanh.f32 %v183_v28  ;;  %v224_v58 = vadd.f32 %v1671_v8, %v219_v7  ;;  %v265_v32 = vadd.f32 %v1067_v3, %v260_v1 }
  0x5c   :  { %v1395_v42 = vpop.eup %682  ;;  %v478_v11 = vmul.f32 %v1391_v39, %v1216_v61  ;;  %v306_v44 = vadd.f32 %v1078_v59, %v301_v62  ;;  %v342_v57 = vadd.f32 %v338_v36, %v333_v2  ;;  %v374_v47 = vmul.f32 %v962_v52, %v1313_v40 }
  0x5d   :  { %v441_v18 = vadd.f32 %v437_v31, %v400_v9  ;;  %v519_v21 = vmul.f32 %v1395_v42, %v1224_v27  ;;  %688 = vtanh.f32 %v224_v58  ;;  %v379_v3 = vmul.f32 %v1329_v43, %v971_v55  ;;  %v1673_v58 = vld [vmem:[#allocation17_spill] sm:$0xff] }
  0x5e   :  { %v1410_v24 = vpop.eup %684  ;;  %690 = vtanh.f32 %v265_v32  ;;  %v347_v59 = vadd.f32 %v1089_v37, %v342_v57  ;;  %v415_v52 = vmul.f32 %v982_v60, %v1313_v40  ;;  %v420_v33 = vmul.f32 %v1329_v43, %v991_v63  ;;  %v1674_v32 = vld [vmem:[#allocation18_spill] sm:$0xff] }
  0x5f   :  { %v482_v53 = vadd.f32 %v478_v11, %v441_v18  ;;  %v159_v15 = vmul.f32 %v1410_v24, %v1138_v29  ;;  %692 = vtanh.f32 %v306_v44  ;;  %v383_v0 = vadd.f32 %v379_v3, %v374_v47 }
  0x60   :  { %694 = vtanh.f32 %v347_v59  ;;  %v424_v55 = vadd.f32 %v420_v33, %v415_v52  ;;  %v456_v37 = vmul.f32 %v1000_v14, %v1313_v40  ;;  %v461_v60 = vmul.f32 %v1329_v43, %v1007_v22 }
  0x61   :  { %v1427_v63 = vpop.eup %686  ;;  %v523_v20 = vadd.f32 %v519_v21, %v482_v53  ;;  %v388_v29 = vadd.f32 %v1099_v48, %v383_v0  ;;  %v497_v56 = vmul.f32 %v1018_v30, %v1313_v40  ;;  %v502_v6 = vmul.f32 %v1329_v43, %v1027_v38  ;;  %v1672_v43 = vld [vmem:[#allocation16_spill] sm:$0xff] }
  0x62   :  { %v192_v14 = vmul.f32 %v1427_v63, %v1148_v46  ;;  %v429_v22 = vadd.f32 %v1108_v12, %v424_v55  ;;  %v465_v5 = vadd.f32 %v461_v60, %v456_v37  ;;  %v1442_v28 = vstv %s1389_s3 }
  0x63   :  { %v1444_v7 = vpop.eup %688  ;;  %v537_v30 = vadd.f32 %v1232_v35, %v523_v20  ;;  %696 = vtanh.f32 %v388_v29  ;;  %v506_v38 = vadd.f32 %v502_v6, %v497_v56  ;;  %v161_v48 = vmul.f32 %v1672_v43, %v1442_v28  ;;  %v1677_v6 = vld [vmem:[#allocation21_spill] sm:$0xff] }
  0x64   :  { %v1451_v46 = vpop.eup %690  ;;  %v196_v12 = vadd.f32 %v192_v14, %v159_v15  ;;  %v233_v40 = vmul.f32 %v1444_v7, %v1159_v54  ;;  %698 = vtanh.f32 %v429_v22  ;;  %v470_v1 = vadd.f32 %v1117_v19, %v465_v5 }
  0x65   :  { %v1456_v31 = vpop.eup %692  ;;  %541 = vst [vmem:[%s1619_s5 + $0x10] sm:$0xff] %v537_v30  ;;  %v274_v62 = vmul.f32 %v1451_v46, %v1169_v17  ;;  %v511_v2 = vadd.f32 %v1128_v16, %v506_v38  ;;  %v1467_v36 = vstv %s1402_s11  ;;  %v1470_v54 = vstv %s1408_s12  ;;  %v1679_v38 = vld [vmem:[#allocation26_spill] sm:$0xff] }
  0x66   :  { %v1472_v19 = vpop.eup %694  ;;  %v237_v9 = vadd.f32 %v233_v40, %v196_v12  ;;  %v315_v8 = vmul.f32 %v1456_v31, %v1180_v50  ;;  %700 = vtanh.f32 %v470_v1  ;;  %v198_v17 = vmul.f32 %v1673_v58, %v1467_v36  ;;  %v1675_v50 = vld [vmem:[#allocation19_spill] sm:$0xff]  ;;  %v1682_v58 = vld [vmem:[#allocation28_spill] sm:$0xff] }
  0x67   :  { %v356_v16 = vmul.f32 %v1472_v19, %v1188_v10  ;;  %702 = vtanh.f32 %v511_v2  ;;  %v239_v11 = vmul.f32 %v1674_v32, %v1470_v54  ;;  %v1485_v44 = vstv %s1419_s13  ;;  %v1676_v10 = vld [vmem:[#allocation20_spill] sm:$0xff]  ;;  %v1680_v40 = vld [vmem:[#allocation27_spill] sm:$0xff] }
  0x68   :  { %v278_v57 = vadd.f32 %v274_v62, %v237_v9  ;;  %v202_v47 = vadd.f32 %v198_v17, %v161_v48  ;;  %v280_v18 = vmul.f32 %v1675_v50, %v1485_v44  ;;  %v1490_v21 = vstv %s1425_s14  ;;  %v1681_v2 = vld [vmem:[#allocation23_spill] sm:$0xff] }
  0x69   :  { %v1492_v3 = vpop.eup %696  ;;  %v321_v59 = vmul.f32 %v1676_v10, %v1490_v21  ;;  %v1497_v52 = vstv %s1434_s4  ;;  %v1504_v55 = vstv %s1439_s15  ;;  %v1507_v37 = vstv %s1447_s16 }
  0x6a   :  { %v1499_v33 = vpop.eup %698  ;;  %v319_v53 = vadd.f32 %v315_v8, %v278_v57  ;;  %v397_v15 = vmul.f32 %v1492_v3, %v1198_v49  ;;  %v243_v0 = vadd.f32 %v239_v11, %v202_v47  ;;  %v362_v14 = vmul.f32 %v1677_v6, %v1497_v52  ;;  %v1678_v49 = vld [vmem:[#allocation22_spill] sm:$0xff]  ;;  %v1684_v47 = vld [vmem:[#allocation24_spill] sm:$0xff] }
  0x6b   :  { %v438_v29 = vmul.f32 %v1499_v33, %v1206_v26  ;;  %v403_v5 = vmul.f32 %v1678_v49, %v1504_v55  ;;  %v1522_v30 = vstv %s1464_s19  ;;  %v162_v43 = vmul.f32 %v1679_v38, %v1442_v28 }
  0x6c   :  { %v1509_v60 = vpop.eup %700  ;;  %v360_v20 = vadd.f32 %v356_v16, %v319_v53  ;;  %v284_v56 = vadd.f32 %v280_v18, %v243_v0  ;;  %v199_v1 = vmul.f32 %v1680_v40, %v1467_v36  ;;  %v444_v9 = vmul.f32 %v1681_v2, %v1507_v37 }
  0x6d   :  { %v1515_v22 = vpop.eup %702  ;;  %v479_v26 = vmul.f32 %v1509_v60, %v1216_v61  ;;  %v1535_v8 = vstv %s1480_s20  ;;  %v240_v17 = vmul.f32 %v1682_v58, %v1470_v54  ;;  %v1683_v61 = vld [vmem:[#allocation29_spill] sm:$0xff]  ;;  %v485_v50 = vmul.f32 %v1684_v47, %v1522_v30 }
  0x6e   :  { %v401_v48 = vadd.f32 %v397_v15, %v360_v20  ;;  %v325_v12 = vadd.f32 %v321_v59, %v284_v56  ;;  %v520_v62 = vmul.f32 %v1515_v22, %v1224_v27  ;;  %v203_v11 = vadd.f32 %v199_v1, %v162_v43  ;;  %v1685_v27 = vld [vmem:[#allocation30_spill] sm:$0xff]  ;;  %v1686_v20 = vld [vmem:[#allocation25_spill] sm:$0xff]  ;;  %v1687_v56 = vld [vmem:[#allocation31_spill] sm:$0xff] }
  0x6f   :  { %v281_v57 = vmul.f32 %v1683_v61, %v1485_v44  ;;  %v322_v18 = vmul.f32 %v1685_v27, %v1490_v21  ;;  %v163_v10 = vmul.f32 %v1289_v51, %v1442_v28  ;;  %v200_v0 = vmul.f32 %v1295_v34, %v1467_v36 }
  0x70   :  { %v442_v16 = vadd.f32 %v438_v29, %v401_v48  ;;  %v366_v32 = vadd.f32 %v362_v14, %v325_v12  ;;  %v244_v15 = vadd.f32 %v240_v17, %v203_v11  ;;  %v526_v29 = vmul.f32 %v1686_v20, %v1535_v8  ;;  %v1690_v11 = vld [vmem:[#allocation34_spill] sm:$0xff] }
  0x71   :  { %v363_v6 = vmul.f32 %v1687_v56, %v1497_v52  ;;  %v241_v14 = vmul.f32 %v1315_v25, %v1470_v54  ;;  %v282_v49 = vmul.f32 %v1338_v45, %v1485_v44  ;;  %v543_v48 = vstv %s1517_s21  ;;  %v1689_v25 = vld [vmem:[#allocation33_spill] sm:$0xff] }
  0x72   :  { %v483_v59 = vadd.f32 %v479_v26, %v442_v16  ;;  %v407_v53 = vadd.f32 %v403_v5, %v366_v32  ;;  %v285_v43 = vadd.f32 %v281_v57, %v244_v15  ;;  %v204_v5 = vadd.f32 %v200_v0, %v163_v10  ;;  %v1688_v26 = vld [vmem:[#allocation32_spill] sm:$0xff] }
  0x73   :  { %v404_v34 = vmul.f32 %v1688_v26, %v1504_v55  ;;  %v323_v12 = vmul.f32 %v1345_v13, %v1490_v21  ;;  %v445_v17 = vmul.f32 %v1689_v25, %v1507_v37  ;;  %v164_v45 = vmul.f32 %v1410_v24, %v1442_v28 }
  0x74   :  { %v524_v38 = vadd.f32 %v520_v62, %v483_v59  ;;  %v448_v51 = vadd.f32 %v444_v9, %v407_v53  ;;  %v326_v2 = vadd.f32 %v322_v18, %v285_v43  ;;  %v245_v58 = vadd.f32 %v241_v14, %v204_v5 }
  0x75   :  { %v201_v62 = vmul.f32 %v1427_v63, %v1467_v36  ;;  %v242_v9 = vmul.f32 %v1444_v7, %v1470_v54  ;;  %v364_v32 = vmul.f32 %v1350_v23, %v1497_v52  ;;  %v486_v61 = vmul.f32 %v1690_v11, %v1522_v30 }
  0x76   :  { %v538_v40 = vadd.f32 %v1232_v35, %v524_v38  ;;  %v489_v1 = vadd.f32 %v485_v50, %v448_v51  ;;  %v367_v13 = vadd.f32 %v363_v6, %v326_v2  ;;  %v286_v16 = vadd.f32 %v282_v49, %v245_v58  ;;  %v1691_v50 = vld [vmem:[#allocation35_spill] sm:$0xff] }
  0x77   :  { %v205_v24 = vadd.f32 %v201_v62, %v164_v45  ;;  %v283_v63 = vmul.f32 %v1451_v46, %v1485_v44  ;;  %v405_v54 = vmul.f32 %v1372_v41, %v1504_v55  ;;  %v324_v47 = vmul.f32 %v1456_v31, %v1490_v21 }
  0x78   :  { %542 = vst [vmem:[%s1619_s5 + $0x18] sm:$0xff] %v538_v40  ;;  %v530_v35 = vadd.f32 %v526_v29, %v489_v1  ;;  %v408_v36 = vadd.f32 %v404_v34, %v367_v13  ;;  %v327_v7 = vadd.f32 %v323_v12, %v286_v16  ;;  %v527_v27 = vmul.f32 %v1691_v50, %v1535_v8 }
  0x79   :  { %v246_v57 = vadd.f32 %v242_v9, %v205_v24  ;;  %v446_v46 = vmul.f32 %v1378_v4, %v1507_v37  ;;  %v365_v41 = vmul.f32 %v1472_v19, %v1497_v52  ;;  %v487_v31 = vmul.f32 %v1391_v39, %v1522_v30 }
  0x7a   :  { %v544_v28 = vadd.f32 %v543_v48, %v530_v35  ;;  %v449_v23 = vadd.f32 %v445_v17, %v408_v36  ;;  %v368_v18 = vadd.f32 %v364_v32, %v327_v7  ;;  %v406_v53 = vmul.f32 %v1492_v3, %v1504_v55 }
  0x7b   :  { %v287_v44 = vadd.f32 %v283_v63, %v246_v57  ;;  %v528_v20 = vmul.f32 %v1395_v42, %v1535_v8  ;;  %v447_v4 = vmul.f32 %v1499_v33, %v1507_v37  ;;  %v488_v6 = vmul.f32 %v1509_v60, %v1522_v30 }
  0x7c   :  { %614 = vst [vmem:[%s1619_s5 + $0x20] sm:$0xff] %v544_v28  ;;  %v490_v10 = vadd.f32 %v486_v61, %v449_v23  ;;  %v409_v59 = vadd.f32 %v405_v54, %v368_v18  ;;  %v529_v55 = vmul.f32 %v1515_v22, %v1535_v8 }
  0x7d   :  { %v328_v21 = vadd.f32 %v324_v47, %v287_v44 }
  0x7e   :  { %v531_v15 = vadd.f32 %v527_v27, %v490_v10  ;;  %v450_v0 = vadd.f32 %v446_v46, %v409_v59 }
  0x7f   :  { %v369_v29 = vadd.f32 %v365_v41, %v328_v21 }
  0x80   :  { %v545_v56 = vadd.f32 %v543_v48, %v531_v15  ;;  %v491_v19 = vadd.f32 %v487_v31, %v450_v0 }
  0x81   :  { %v410_v52 = vadd.f32 %v406_v53, %v369_v29 }
  0x82   :  { %615 = vst [vmem:[%s1619_s5 + $0x28] sm:$0xff] %v545_v56  ;;  %v532_v39 = vadd.f32 %v528_v20, %v491_v19 }
  0x83   :  { %v451_v3 = vadd.f32 %v447_v4, %v410_v52 }
  0x84   :  { %v546_v42 = vadd.f32 %v543_v48, %v532_v39 }
  0x85   :  { %v492_v14 = vadd.f32 %v488_v6, %v451_v3 }
  0x86   :  { %616 = vst [vmem:[%s1619_s5 + $0x30] sm:$0xff] %v546_v42 }
  0x87   :  { %v533_v33 = vadd.f32 %v529_v55, %v492_v14 }
  0x89   :  { %v547_v37 = vadd.f32 %v543_v48, %v533_v33 }
  0x8b   :  { %617 = vst [vmem:[%s1619_s5 + $0x38] sm:$0xff] %v547_v37 }
  0x8c   :  { %557 = vsyncpa [#allocation3], 1 }
  0x8d   :  { %558 = vsyncpa [#allocation5], 1 }
  0x8e   :  { %559 = vsyncpa [#allocation8], 1 }

</bundles_post_ra>
